<compile_context>
chip_gen: v7x
topology: tpu7x:2x2x1
jax: 0.10.0
libtpu: 0.0.40
codegen_flags: <defaults>
</compile_context>

<pallas_src>
import functools
import math

import jax
import jax.numpy as jnp
from jax.experimental import pallas as pl
from jax.experimental.pallas import tpu as pltpu

LN_EPS = 1e-5                     # torch.nn.LayerNorm default
MATMUL_DTYPE = jnp.bfloat16       # MXU-native on v5e/v6e/v7x; accumulation stays f32
_INV_SQRT2 = 0.7071067811865476
_MAX_UNROLL = 8                   # static unroll up to this many hidden layers


def _round_up(x, m):
    return (x + m - 1) // m * m


def _pad_to(a, shape):
    pads = [(0, s - d) for d, s in zip(a.shape, shape)]
    return jnp.pad(a, pads)


def _gelu_exact(x):
    # Exact erf-based GELU (matches torch.nn.GELU() default, approximate='none').
    return 0.5 * x * (1.0 + jax.lax.erf(x * _INV_SQRT2))


def _nbytes(a):
    return a.size * a.dtype.itemsize


def _pick_vmem_limit_bytes():
    # Generation-aware VMEM budget: ~87.5% of physical, capped at 112 MiB.
    try:
        cap = int(pltpu.get_tpu_info().vmem_capacity_bytes)
    except Exception:
        cap = 64 * 1024 * 1024    # conservative fallback: assume v7x-sized VMEM
    return min(int(cap * 7 // 8), 112 * 1024 * 1024)


# ----------------------------- fused kernel -----------------------------

def mlp_fused_kernel(x_ref, w1_ref, p1_ref, *rest, hidden_layers, h_valid):
    """One batch tile through the entire MLP.

    x_ref  : (tb, in_pad)            activations (bf16, zero-padded features)
    w1_ref : (in_pad, h_pad)         first Linear weight (transposed, padded, bf16)
    p1_ref : (8, h_pad)              rows 0/1/2 = bias / gamma / beta of layer 1 (f32)
    [wh_ref: (L, h_pad, h_pad)]      stacked hidden Linear weights  (only if L > 0)
    [ph_ref: (L, 8, h_pad)]          stacked bias/gamma/beta         (only if L > 0)
    wo_ref : (h_pad, o_pad)          output Linear weight
    bo_ref : (8, o_pad)              row 0 = output bias
    o_ref  : (tb, o_pad)             sigmoid output (f32, lane-dense)
    """
    if hidden_layers > 0:
        wh_ref, ph_ref, wo_ref, bo_ref, o_ref = rest
    else:
        wo_ref, bo_ref, o_ref = rest

    h_pad = w1_ref.shape[1]
    inv_h = jnp.float32(1.0 / h_valid)
    needs_mask = (h_valid != h_pad)
    if needs_mask:
        col = jax.lax.broadcasted_iota(jnp.int32, (1, h_pad), 1)
        mask = (col < h_valid).astype(jnp.float32)

    def mm(a, w):
        # bf16 (or f32) MXU inputs, f32 accumulation.
        return jnp.dot(a.astype(w.dtype), w, preferred_element_type=jnp.float32)

    def ln_gelu(h, params):
        # params: (8, h_pad), rows 0/1/2 = bias / gamma / beta (padded lanes are 0).
        b, g, beta = params[0:1, :], params[1:2, :], params[2:3, :]
        h = h + b
        # Padded lanes of h are exactly 0 (zero weight columns + zero bias), so the
        # mean reduction needs no mask; only the variance term does.
        mean = jnp.sum(h, axis=-1, keepdims=True) * inv_h
        d = h - mean
        if needs_mask:
            d = d * mask
        var = jnp.sum(d * d, axis=-1, keepdims=True) * inv_h   # biased var, as torch LN
        hn = (h - mean) * jax.lax.rsqrt(var + LN_EPS)
        hn = hn * g + beta            # padded lanes -> 0 (gamma = beta = 0 there)
        return _gelu_exact(hn)        # GELU(0) = 0, so padding stays exactly 0

    h = ln_gelu(mm(x_ref[...], w1_ref[...]), p1_ref[...])

    if hidden_layers > 0:
        if hidden_layers <= _MAX_UNROLL:
            for l in range(hidden_layers):                      # static unroll, small L
                h = ln_gelu(mm(h, wh_ref[l]), ph_ref[l])
        else:
            def body(l, hh):                                    # deep stacks: bounded code size
                return ln_gelu(mm(hh, wh_ref[l]), ph_ref[l])
            h = jax.lax.fori_loop(0, hidden_layers, body, h)

    y = mm(h, wo_ref[...]) + bo_ref[0:1, :]
    o_ref[...] = jax.nn.sigmoid(y).astype(o_ref.dtype)


# ----------------------------- wrapper -----------------------------

def pack_params(hidden_params, out_params, in_pad, h_pad, o_pad, matmul_dtype):
    """Zero-pad to lane-aligned shapes and stack per-layer params."""
    w1, b1, g1, be1 = hidden_params[0]
    w1p = _pad_to(w1.astype(matmul_dtype), (in_pad, h_pad))
    p1 = jnp.zeros((8, h_pad), jnp.float32)
    p1 = p1.at[0, : b1.shape[1]].set(b1[0])
    p1 = p1.at[1, : g1.shape[1]].set(g1[0])
    p1 = p1.at[2, : be1.shape[1]].set(be1[0])

    rest = hidden_params[1:]
    if len(rest) == 0:
        wh, ph = None, None
    else:
        wh = jnp.zeros((len(rest), h_pad, h_pad), matmul_dtype)
        ph = jnp.zeros((len(rest), 8, h_pad), jnp.float32)
        for l, (w, b, g, be) in enumerate(rest):
            wh = wh.at[l].set(_pad_to(w.astype(matmul_dtype), (h_pad, h_pad)))
            ph = ph.at[l, 0, : b.shape[1]].set(b[0])
            ph = ph.at[l, 1, : g.shape[1]].set(g[0])
            ph = ph.at[l, 2, : be.shape[1]].set(be[0])

    w_out, b_out = out_params
    wo = _pad_to(w_out.astype(matmul_dtype), (h_pad, o_pad))
    bo = jnp.zeros((8, o_pad), jnp.float32).at[0, : b_out.shape[1]].set(b_out[0])
    return w1p, p1, wh, ph, wo, bo


def mlp_forward(x, hidden_params, out_params, *, tile_b=512, matmul_dtype=MATMUL_DTYPE):
    B, in_size = x.shape
    H = hidden_params[0][0].shape[1]
    O = out_params[0].shape[1]
    hidden_layers = len(hidden_params) - 1

    in_pad = _round_up(in_size, 128)
    h_pad = _round_up(H, 128)
    o_pad = _round_up(O, 128)

    # Batch tiling: big tiles for HBM roofline, but keep >= 2 grid steps when the
    # batch is moderate so v7x's 2 TensorCores both get a share of the parallel axis.
    b_req = _round_up(B, 8)
    tb = min(tile_b, b_req)
    if b_req > 8 and b_req // tb < 2:
        tb = _round_up((b_req + 1) // 2, 8)
    b_pad = _round_up(B, tb)

    # Stream activations in the MXU dtype (halves per-tile HBM bytes when bf16).
    x_pad = _pad_to(x.astype(matmul_dtype), (b_pad, in_pad))
    w1p, p1, wh, ph, wo, bo = pack_params(hidden_params, out_params,
                                          in_pad, h_pad, o_pad, matmul_dtype)

    kernel = functools.partial(mlp_fused_kernel,
                               hidden_layers=hidden_layers, h_valid=H)

    # Constant weight/param blocks: fetched once, single-buffered.
    resident = dict(pipeline_mode=pl.Buffered(1))
    in_specs = [
        pl.BlockSpec((tb, in_pad), lambda i: (i, 0)),               # activations: batch-tiled
        pl.BlockSpec((in_pad, h_pad), lambda i: (0, 0), **resident),
        pl.BlockSpec((8, h_pad), lambda i: (0, 0), **resident),
    ]
    args = [x_pad, w1p, p1]
    if hidden_layers > 0:
        in_specs += [
            pl.BlockSpec(wh.shape, lambda i: (0, 0, 0), **resident),
            pl.BlockSpec(ph.shape, lambda i: (0, 0, 0), **resident),
        ]
        args += [wh, ph]
    in_specs += [
        pl.BlockSpec((h_pad, o_pad), lambda i: (0, 0), **resident),
        pl.BlockSpec((8, o_pad), lambda i: (0, 0), **resident),
    ]
    args += [wo, bo]

    # Advisory cost estimate for XLA's scheduler.
    L = hidden_layers
    flops = 2 * b_pad * (in_pad * h_pad + L * h_pad * h_pad + h_pad * o_pad)
    transcendentals = b_pad * ((L + 1) * h_pad + o_pad)       # erf per hidden act + sigmoid
    weight_bytes = sum(_nbytes(a) for a in args[1:])
    bytes_accessed = _nbytes(x_pad) + weight_bytes + b_pad * o_pad * 4
    cost = pl.CostEstimate(flops=flops, transcendentals=transcendentals,
                           bytes_accessed=bytes_accessed)

    out = pl.pallas_call(
        kernel,
        out_shape=jax.ShapeDtypeStruct((b_pad, o_pad), jnp.float32),
        grid=(b_pad // tb,),
        in_specs=in_specs,
        out_specs=pl.BlockSpec((tb, o_pad), lambda i: (i, 0)),      # lane-dense output
        compiler_params=pltpu.CompilerParams(
            dimension_semantics=("parallel",),                      # pipeline + v7x 2-TC sharding
            vmem_limit_bytes=_pick_vmem_limit_bytes(),              # ~56 MiB v7x, ~112 MiB v5e/v6e
        ),
        cost_estimate=cost,
    )(*args)

    return out[:B, :O]


# --------------------- parameters & reference ---------------------

def init_mlp_params(key, input_size, output_size, hidden_layer_size, hidden_layers):
    """torch-default-style init: U(-1/sqrt(fan_in), 1/sqrt(fan_in)) for Linear,
    ones/zeros for LayerNorm gamma/beta. Weights stored as (in, out)."""
    hidden_params = []
    dims = [input_size] + [hidden_layer_size] * (hidden_layers + 1)
    for i in range(hidden_layers + 1):
        fan_in = dims[i]
        bound = 1.0 / math.sqrt(fan_in)
        key, kw, kb = jax.random.split(key, 3)
        w = jax.random.uniform(kw, (dims[i], dims[i + 1]), jnp.float32, -bound, bound)
        b = jax.random.uniform(kb, (1, dims[i + 1]), jnp.float32, -bound, bound)
        g = jnp.ones((1, dims[i + 1]), jnp.float32)
        be = jnp.zeros((1, dims[i + 1]), jnp.float32)
        hidden_params.append((w, b, g, be))
    bound = 1.0 / math.sqrt(hidden_layer_size)
    key, kw, kb = jax.random.split(key, 3)
    w_out = jax.random.uniform(kw, (hidden_layer_size, output_size), jnp.float32, -bound, bound)
    b_out = jax.random.uniform(kb, (1, output_size), jnp.float32, -bound, bound)
    return hidden_params, (w_out, b_out)


def mlp_forward_ref(x, hidden_params, out_params):
    # pure-JAX f32 reference for correctness checking
    h = x
    for (w, b, g, be) in hidden_params:
        y = h @ w + b
        mean = jnp.mean(y, axis=-1, keepdims=True)
        var = jnp.mean((y - mean) ** 2, axis=-1, keepdims=True)
        y = (y - mean) * jax.lax.rsqrt(var + LN_EPS) * g + be
        h = 0.5 * y * (1.0 + jax.lax.erf(y * _INV_SQRT2))
    w_out, b_out = out_params
    return jax.nn.sigmoid(h @ w_out + b_out)


if __name__ == "__main__":
    batch = 8
    input_size = 20
    output_size = 1
    hidden_layer_size = 32
    hidden_layers = 2

    key = jax.random.PRNGKey(0)
    key, kx, kp = jax.random.split(key, 3)
    x = jax.random.normal(kx, (batch, input_size), dtype=jnp.float32)
    hidden_params, out_params = init_mlp_params(
        kp, input_size, output_size, hidden_layer_size, hidden_layers
    )

    out = mlp_forward(x, hidden_params, out_params)
    out = jax.block_until_ready(out)

    ref = mlp_forward_ref(x, hidden_params, out_params)
    assert out.shape == (batch, output_size)
    # bf16 MXU inputs vs an f32 reference: sigmoid outputs agree to ~1e-3; 2e-2 is safe.
    assert jnp.allclose(out, ref, rtol=2e-2, atol=2e-2), (
        f"mismatch vs pure-JAX reference: max abs err = {jnp.max(jnp.abs(out - ref))}"
    )

    print("KERNEL_OK")
</pallas_src>

<mosaic_0001>
module attributes {stable_mosaic.version = 11 : i64} {
  func.func @mlp_fused_kernel(%arg0: i32, %arg1: memref<8x128xbf16, #tpu.memory_space<vmem>>, %arg2: memref<128x128xbf16, #tpu.memory_space<vmem>>, %arg3: memref<8x128xf32, #tpu.memory_space<vmem>>, %arg4: memref<2x128x128xbf16, #tpu.memory_space<vmem>>, %arg5: memref<2x8x128xf32, #tpu.memory_space<vmem>>, %arg6: memref<128x128xbf16, #tpu.memory_space<vmem>>, %arg7: memref<8x128xf32, #tpu.memory_space<vmem>>, %arg8: memref<8x128xf32, #tpu.memory_space<vmem>>) attributes {dimension_semantics = [#tpu.dimension_semantics<parallel>], iteration_bounds = array<i64: 1>, scalar_prefetch = 0 : i64, scratch_operands = 0 : i64, tpu.core_type = #tpu.core_type<tc>, window_params = [{transform_indices = @transform_0, window_bounds = array<i64: 8, 128>}, {pipeline_mode = #tpu.pipeline_mode<synchronous>, transform_indices = @transform_1, window_bounds = array<i64: 128, 128>}, {pipeline_mode = #tpu.pipeline_mode<synchronous>, transform_indices = @transform_2, window_bounds = array<i64: 8, 128>}, {pipeline_mode = #tpu.pipeline_mode<synchronous>, transform_indices = @transform_3, window_bounds = array<i64: 2, 128, 128>}, {pipeline_mode = #tpu.pipeline_mode<synchronous>, transform_indices = @transform_4, window_bounds = array<i64: 2, 8, 128>}, {pipeline_mode = #tpu.pipeline_mode<synchronous>, transform_indices = @transform_5, window_bounds = array<i64: 128, 128>}, {pipeline_mode = #tpu.pipeline_mode<synchronous>, transform_indices = @transform_6, window_bounds = array<i64: 8, 128>}, {transform_indices = @transform_7, window_bounds = array<i64: 8, 128>}]} {
    %0 = tpu.iota {dimensions = array<i32: 1>} : vector<1x128xi32>
    %c32_i32 = arith.constant 32 : i32
    %1 = vector.broadcast %c32_i32 : i32 to vector<1x128xi32>
    %2 = arith.cmpi slt, %0, %1 : vector<1x128xi32>
    %3 = arith.extui %2 : vector<1x128xi1> to vector<1x128xi32>
    %4 = arith.sitofp %3 : vector<1x128xi32> to vector<1x128xf32>
    %c0 = arith.constant 0 : index
    %c0_0 = arith.constant 0 : index
    %5 = vector.load %arg1[%c0, %c0_0] : memref<8x128xbf16, #tpu.memory_space<vmem>>, vector<8x128xbf16>
    %c0_1 = arith.constant 0 : index
    %c0_2 = arith.constant 0 : index
    %6 = vector.load %arg2[%c0_1, %c0_2] : memref<128x128xbf16, #tpu.memory_space<vmem>>, vector<128x128xbf16>
    %cst = arith.constant dense<0.000000e+00> : vector<8x128xf32>
    %7 = tpu.matmul %5, %6, %cst {dimension_numbers = #tpu.dot_dimension_numbers<[1], [0], [0], [1], [0, 0, 1, 1], [], []>} : vector<8x128xbf16>, vector<128x128xbf16>, vector<8x128xf32> -> vector<8x128xf32>
    %c0_3 = arith.constant 0 : index
    %c0_4 = arith.constant 0 : index
    %8 = vector.load %arg3[%c0_3, %c0_4] : memref<8x128xf32, #tpu.memory_space<vmem>>, vector<8x128xf32>
    %9 = vector.extract_strided_slice %8 {offsets = [0, 0], sizes = [1, 128], strides = [1, 1]} : vector<8x128xf32> to vector<1x128xf32>
    %10 = vector.extract_strided_slice %8 {offsets = [1, 0], sizes = [1, 128], strides = [1, 1]} : vector<8x128xf32> to vector<1x128xf32>
    %11 = vector.extract_strided_slice %8 {offsets = [2, 0], sizes = [1, 128], strides = [1, 1]} : vector<8x128xf32> to vector<1x128xf32>
    %12 = vector.broadcast %9 : vector<1x128xf32> to vector<8x128xf32>
    %13 = arith.addf %7, %12 : vector<8x128xf32>
    %cst_5 = arith.constant dense<0.000000e+00> : vector<8xf32>
    %14 = vector.multi_reduction <add>, %13, %cst_5 [1] : vector<8x128xf32> to vector<8xf32>
    %15 = vector.shape_cast %14 : vector<8xf32> to vector<8x1xf32>
    %cst_6 = arith.constant 3.125000e-02 : f32
    %16 = vector.broadcast %cst_6 : f32 to vector<8x1xf32>
    %17 = arith.mulf %15, %16 : vector<8x1xf32>
    %18 = vector.broadcast %17 : vector<8x1xf32> to vector<8x128xf32>
    %19 = arith.subf %13, %18 : vector<8x128xf32>
    %20 = vector.broadcast %4 : vector<1x128xf32> to vector<8x128xf32>
    %21 = arith.mulf %19, %20 : vector<8x128xf32>
    %22 = arith.mulf %21, %21 : vector<8x128xf32>
    %cst_7 = arith.constant dense<0.000000e+00> : vector<8xf32>
    %23 = vector.multi_reduction <add>, %22, %cst_7 [1] : vector<8x128xf32> to vector<8xf32>
    %24 = vector.shape_cast %23 : vector<8xf32> to vector<8x1xf32>
    %cst_8 = arith.constant 3.125000e-02 : f32
    %25 = vector.broadcast %cst_8 : f32 to vector<8x1xf32>
    %26 = arith.mulf %24, %25 : vector<8x1xf32>
    %27 = vector.broadcast %17 : vector<8x1xf32> to vector<8x128xf32>
    %28 = arith.subf %13, %27 : vector<8x128xf32>
    %cst_9 = arith.constant 9.99999974E-6 : f32
    %29 = vector.broadcast %cst_9 : f32 to vector<8x1xf32>
    %30 = arith.addf %26, %29 : vector<8x1xf32>
    %31 = math.rsqrt %30 : vector<8x1xf32>
    %32 = vector.broadcast %31 : vector<8x1xf32> to vector<8x128xf32>
    %33 = arith.mulf %28, %32 : vector<8x128xf32>
    %34 = vector.broadcast %10 : vector<1x128xf32> to vector<8x128xf32>
    %35 = arith.mulf %33, %34 : vector<8x128xf32>
    %36 = vector.broadcast %11 : vector<1x128xf32> to vector<8x128xf32>
    %37 = arith.addf %35, %36 : vector<8x128xf32>
    %cst_10 = arith.constant 5.000000e-01 : f32
    %38 = vector.broadcast %cst_10 : f32 to vector<8x128xf32>
    %39 = arith.mulf %38, %37 : vector<8x128xf32>
    %cst_11 = arith.constant 0.707106769 : f32
    %40 = vector.broadcast %cst_11 : f32 to vector<8x128xf32>
    %41 = arith.mulf %37, %40 : vector<8x128xf32>
    %42 = math.erf %41 : vector<8x128xf32>
    %cst_12 = arith.constant 1.000000e+00 : f32
    %43 = vector.broadcast %cst_12 : f32 to vector<8x128xf32>
    %44 = arith.addf %43, %42 : vector<8x128xf32>
    %45 = arith.mulf %39, %44 : vector<8x128xf32>
    %c0_13 = arith.constant 0 : index
    %c0_14 = arith.constant 0 : index
    %c0_15 = arith.constant 0 : index
    %46 = vector.load %arg4[%c0_13, %c0_14, %c0_15] : memref<2x128x128xbf16, #tpu.memory_space<vmem>>, vector<1x128x128xbf16>
    %47 = vector.shape_cast %46 : vector<1x128x128xbf16> to vector<128x128xbf16>
    %48 = arith.truncf %45 : vector<8x128xf32> to vector<8x128xbf16>
    %cst_16 = arith.constant dense<0.000000e+00> : vector<8x128xf32>
    %49 = tpu.matmul %48, %47, %cst_16 {dimension_numbers = #tpu.dot_dimension_numbers<[1], [0], [0], [1], [0, 0, 1, 1], [], []>} : vector<8x128xbf16>, vector<128x128xbf16>, vector<8x128xf32> -> vector<8x128xf32>
    %c0_17 = arith.constant 0 : index
    %c0_18 = arith.constant 0 : index
    %c0_19 = arith.constant 0 : index
    %50 = vector.load %arg5[%c0_17, %c0_18, %c0_19] : memref<2x8x128xf32, #tpu.memory_space<vmem>>, vector<1x8x128xf32>
    %51 = vector.shape_cast %50 : vector<1x8x128xf32> to vector<8x128xf32>
    %52 = vector.extract_strided_slice %51 {offsets = [0, 0], sizes = [1, 128], strides = [1, 1]} : vector<8x128xf32> to vector<1x128xf32>
    %53 = vector.extract_strided_slice %51 {offsets = [1, 0], sizes = [1, 128], strides = [1, 1]} : vector<8x128xf32> to vector<1x128xf32>
    %54 = vector.extract_strided_slice %51 {offsets = [2, 0], sizes = [1, 128], strides = [1, 1]} : vector<8x128xf32> to vector<1x128xf32>
    %55 = vector.broadcast %52 : vector<1x128xf32> to vector<8x128xf32>
    %56 = arith.addf %49, %55 : vector<8x128xf32>
    %cst_20 = arith.constant dense<0.000000e+00> : vector<8xf32>
    %57 = vector.multi_reduction <add>, %56, %cst_20 [1] : vector<8x128xf32> to vector<8xf32>
    %58 = vector.shape_cast %57 : vector<8xf32> to vector<8x1xf32>
    %cst_21 = arith.constant 3.125000e-02 : f32
    %59 = vector.broadcast %cst_21 : f32 to vector<8x1xf32>
    %60 = arith.mulf %58, %59 : vector<8x1xf32>
    %61 = vector.broadcast %60 : vector<8x1xf32> to vector<8x128xf32>
    %62 = arith.subf %56, %61 : vector<8x128xf32>
    %63 = vector.broadcast %4 : vector<1x128xf32> to vector<8x128xf32>
    %64 = arith.mulf %62, %63 : vector<8x128xf32>
    %65 = arith.mulf %64, %64 : vector<8x128xf32>
    %cst_22 = arith.constant dense<0.000000e+00> : vector<8xf32>
    %66 = vector.multi_reduction <add>, %65, %cst_22 [1] : vector<8x128xf32> to vector<8xf32>
    %67 = vector.shape_cast %66 : vector<8xf32> to vector<8x1xf32>
    %cst_23 = arith.constant 3.125000e-02 : f32
    %68 = vector.broadcast %cst_23 : f32 to vector<8x1xf32>
    %69 = arith.mulf %67, %68 : vector<8x1xf32>
    %70 = vector.broadcast %60 : vector<8x1xf32> to vector<8x128xf32>
    %71 = arith.subf %56, %70 : vector<8x128xf32>
    %cst_24 = arith.constant 9.99999974E-6 : f32
    %72 = vector.broadcast %cst_24 : f32 to vector<8x1xf32>
    %73 = arith.addf %69, %72 : vector<8x1xf32>
    %74 = math.rsqrt %73 : vector<8x1xf32>
    %75 = vector.broadcast %74 : vector<8x1xf32> to vector<8x128xf32>
    %76 = arith.mulf %71, %75 : vector<8x128xf32>
    %77 = vector.broadcast %53 : vector<1x128xf32> to vector<8x128xf32>
    %78 = arith.mulf %76, %77 : vector<8x128xf32>
    %79 = vector.broadcast %54 : vector<1x128xf32> to vector<8x128xf32>
    %80 = arith.addf %78, %79 : vector<8x128xf32>
    %cst_25 = arith.constant 5.000000e-01 : f32
    %81 = vector.broadcast %cst_25 : f32 to vector<8x128xf32>
    %82 = arith.mulf %81, %80 : vector<8x128xf32>
    %cst_26 = arith.constant 0.707106769 : f32
    %83 = vector.broadcast %cst_26 : f32 to vector<8x128xf32>
    %84 = arith.mulf %80, %83 : vector<8x128xf32>
    %85 = math.erf %84 : vector<8x128xf32>
    %cst_27 = arith.constant 1.000000e+00 : f32
    %86 = vector.broadcast %cst_27 : f32 to vector<8x128xf32>
    %87 = arith.addf %86, %85 : vector<8x128xf32>
    %88 = arith.mulf %82, %87 : vector<8x128xf32>
    %c1 = arith.constant 1 : index
    %c0_28 = arith.constant 0 : index
    %c0_29 = arith.constant 0 : index
    %89 = vector.load %arg4[%c1, %c0_28, %c0_29] : memref<2x128x128xbf16, #tpu.memory_space<vmem>>, vector<1x128x128xbf16>
    %90 = vector.shape_cast %89 : vector<1x128x128xbf16> to vector<128x128xbf16>
    %91 = arith.truncf %88 : vector<8x128xf32> to vector<8x128xbf16>
    %cst_30 = arith.constant dense<0.000000e+00> : vector<8x128xf32>
    %92 = tpu.matmul %91, %90, %cst_30 {dimension_numbers = #tpu.dot_dimension_numbers<[1], [0], [0], [1], [0, 0, 1, 1], [], []>} : vector<8x128xbf16>, vector<128x128xbf16>, vector<8x128xf32> -> vector<8x128xf32>
    %c1_31 = arith.constant 1 : index
    %c0_32 = arith.constant 0 : index
    %c0_33 = arith.constant 0 : index
    %93 = vector.load %arg5[%c1_31, %c0_32, %c0_33] : memref<2x8x128xf32, #tpu.memory_space<vmem>>, vector<1x8x128xf32>
    %94 = vector.shape_cast %93 : vector<1x8x128xf32> to vector<8x128xf32>
    %95 = vector.extract_strided_slice %94 {offsets = [0, 0], sizes = [1, 128], strides = [1, 1]} : vector<8x128xf32> to vector<1x128xf32>
    %96 = vector.extract_strided_slice %94 {offsets = [1, 0], sizes = [1, 128], strides = [1, 1]} : vector<8x128xf32> to vector<1x128xf32>
    %97 = vector.extract_strided_slice %94 {offsets = [2, 0], sizes = [1, 128], strides = [1, 1]} : vector<8x128xf32> to vector<1x128xf32>
    %98 = vector.broadcast %95 : vector<1x128xf32> to vector<8x128xf32>
    %99 = arith.addf %92, %98 : vector<8x128xf32>
    %cst_34 = arith.constant dense<0.000000e+00> : vector<8xf32>
    %100 = vector.multi_reduction <add>, %99, %cst_34 [1] : vector<8x128xf32> to vector<8xf32>
    %101 = vector.shape_cast %100 : vector<8xf32> to vector<8x1xf32>
    %cst_35 = arith.constant 3.125000e-02 : f32
    %102 = vector.broadcast %cst_35 : f32 to vector<8x1xf32>
    %103 = arith.mulf %101, %102 : vector<8x1xf32>
    %104 = vector.broadcast %103 : vector<8x1xf32> to vector<8x128xf32>
    %105 = arith.subf %99, %104 : vector<8x128xf32>
    %106 = vector.broadcast %4 : vector<1x128xf32> to vector<8x128xf32>
    %107 = arith.mulf %105, %106 : vector<8x128xf32>
    %108 = arith.mulf %107, %107 : vector<8x128xf32>
    %cst_36 = arith.constant dense<0.000000e+00> : vector<8xf32>
    %109 = vector.multi_reduction <add>, %108, %cst_36 [1] : vector<8x128xf32> to vector<8xf32>
    %110 = vector.shape_cast %109 : vector<8xf32> to vector<8x1xf32>
    %cst_37 = arith.constant 3.125000e-02 : f32
    %111 = vector.broadcast %cst_37 : f32 to vector<8x1xf32>
    %112 = arith.mulf %110, %111 : vector<8x1xf32>
    %113 = vector.broadcast %103 : vector<8x1xf32> to vector<8x128xf32>
    %114 = arith.subf %99, %113 : vector<8x128xf32>
    %cst_38 = arith.constant 9.99999974E-6 : f32
    %115 = vector.broadcast %cst_38 : f32 to vector<8x1xf32>
    %116 = arith.addf %112, %115 : vector<8x1xf32>
    %117 = math.rsqrt %116 : vector<8x1xf32>
    %118 = vector.broadcast %117 : vector<8x1xf32> to vector<8x128xf32>
    %119 = arith.mulf %114, %118 : vector<8x128xf32>
    %120 = vector.broadcast %96 : vector<1x128xf32> to vector<8x128xf32>
    %121 = arith.mulf %119, %120 : vector<8x128xf32>
    %122 = vector.broadcast %97 : vector<1x128xf32> to vector<8x128xf32>
    %123 = arith.addf %121, %122 : vector<8x128xf32>
    %cst_39 = arith.constant 5.000000e-01 : f32
    %124 = vector.broadcast %cst_39 : f32 to vector<8x128xf32>
    %125 = arith.mulf %124, %123 : vector<8x128xf32>
    %cst_40 = arith.constant 0.707106769 : f32
    %126 = vector.broadcast %cst_40 : f32 to vector<8x128xf32>
    %127 = arith.mulf %123, %126 : vector<8x128xf32>
    %128 = math.erf %127 : vector<8x128xf32>
    %cst_41 = arith.constant 1.000000e+00 : f32
    %129 = vector.broadcast %cst_41 : f32 to vector<8x128xf32>
    %130 = arith.addf %129, %128 : vector<8x128xf32>
    %131 = arith.mulf %125, %130 : vector<8x128xf32>
    %c0_42 = arith.constant 0 : index
    %c0_43 = arith.constant 0 : index
    %132 = vector.load %arg6[%c0_42, %c0_43] : memref<128x128xbf16, #tpu.memory_space<vmem>>, vector<128x128xbf16>
    %133 = arith.truncf %131 : vector<8x128xf32> to vector<8x128xbf16>
    %cst_44 = arith.constant dense<0.000000e+00> : vector<8x128xf32>
    %134 = tpu.matmul %133, %132, %cst_44 {dimension_numbers = #tpu.dot_dimension_numbers<[1], [0], [0], [1], [0, 0, 1, 1], [], []>} : vector<8x128xbf16>, vector<128x128xbf16>, vector<8x128xf32> -> vector<8x128xf32>
    %c0_45 = arith.constant 0 : index
    %c0_46 = arith.constant 0 : index
    %135 = vector.load %arg7[%c0_45, %c0_46] : memref<8x128xf32, #tpu.memory_space<vmem>>, vector<1x128xf32>
    %136 = vector.broadcast %135 : vector<1x128xf32> to vector<8x128xf32>
    %137 = arith.addf %134, %136 : vector<8x128xf32>
    %138 = arith.negf %137 : vector<8x128xf32>
    %139 = math.exp %138 : vector<8x128xf32>
    %cst_47 = arith.constant 1.000000e+00 : f32
    %140 = vector.broadcast %cst_47 : f32 to vector<8x128xf32>
    %141 = arith.addf %140, %139 : vector<8x128xf32>
    %142 = arith.divf %140, %141 : vector<8x128xf32>
    %c0_48 = arith.constant 0 : index
    %c0_49 = arith.constant 0 : index
    %143 = vector.load %arg8[%c0_48, %c0_49] : memref<8x128xf32, #tpu.memory_space<vmem>>, vector<8x128xf32>
    tpu.vector_store %arg8[%c0_48, %c0_49], %142 {strides = array<i32>} : memref<8x128xf32, #tpu.memory_space<vmem>>, vector<8x128xf32>,
    return
  }
  func.func @transform_0(%arg0: i32) -> (i32, i32) {
    %c0_i32 = arith.constant 0 : i32
    %c0_i32_0 = arith.constant 0 : i32
    return %arg0, %c0_i32 : i32, i32
  }
  func.func @transform_1(%arg0: i32) -> (i32, i32) {
    %c0_i32 = arith.constant 0 : i32
    %c0_i32_0 = arith.constant 0 : i32
    %c0_i32_1 = arith.constant 0 : i32
    return %c0_i32, %c0_i32_0 : i32, i32
  }
  func.func @transform_2(%arg0: i32) -> (i32, i32) {
    %c0_i32 = arith.constant 0 : i32
    %c0_i32_0 = arith.constant 0 : i32
    %c0_i32_1 = arith.constant 0 : i32
    return %c0_i32, %c0_i32_0 : i32, i32
  }
  func.func @transform_3(%arg0: i32) -> (i32, i32, i32) {
    %c0_i32 = arith.constant 0 : i32
    %c0_i32_0 = arith.constant 0 : i32
    %c0_i32_1 = arith.constant 0 : i32
    %c0_i32_2 = arith.constant 0 : i32
    return %c0_i32, %c0_i32_0, %c0_i32_1 : i32, i32, i32
  }
  func.func @transform_4(%arg0: i32) -> (i32, i32, i32) {
    %c0_i32 = arith.constant 0 : i32
    %c0_i32_0 = arith.constant 0 : i32
    %c0_i32_1 = arith.constant 0 : i32
    %c0_i32_2 = arith.constant 0 : i32
    return %c0_i32, %c0_i32_0, %c0_i32_1 : i32, i32, i32
  }
  func.func @transform_5(%arg0: i32) -> (i32, i32) {
    %c0_i32 = arith.constant 0 : i32
    %c0_i32_0 = arith.constant 0 : i32
    %c0_i32_1 = arith.constant 0 : i32
    return %c0_i32, %c0_i32_0 : i32, i32
  }
  func.func @transform_6(%arg0: i32) -> (i32, i32) {
    %c0_i32 = arith.constant 0 : i32
    %c0_i32_0 = arith.constant 0 : i32
    %c0_i32_1 = arith.constant 0 : i32
    return %c0_i32, %c0_i32_0 : i32, i32
  }
  func.func @transform_7(%arg0: i32) -> (i32, i32) {
    %c0_i32 = arith.constant 0 : i32
    %c0_i32_0 = arith.constant 0 : i32
    return %arg0, %c0_i32 : i32, i32
  }
}

</mosaic_0001>

<bundles_post_ra>
// kernel: tpu_custom_call.1
= control target key start
LH: loop header
LB: loop body
LE: loop exit
PB: predicated region body
PF: predicated region fallthrough
CT: control target
= control target key end

     0   :  { %12 = vsyncpa [#allocation3], 0  ;;  %s1245_s0 = inlined_call_operand.hbm [shape: bf16[8,128], index: 0, kind: input, shape index: {}]   ;;  %s1246_s1 = inlined_call_operand.hbm [shape: bf16[128,128], index: 1, kind: input, shape index: {}]   ;;  %s1247_s2 = inlined_call_operand.hbm [shape: f32[8,128], index: 2, kind: input, shape index: {}]   ;;  %s1248_s3 = inlined_call_operand.hbm [shape: bf16[2,128,128], index: 3, kind: input, shape index: {}]   ;;  %s1249_s4 = inlined_call_operand.hbm [shape: f32[2,8,128], index: 4, kind: input, shape index: {}]   ;;  %s1250_s5 = inlined_call_operand.hbm [shape: bf16[128,128], index: 5, kind: input, shape index: {}]   ;;  %s1251_s6 = inlined_call_operand.vmem [shape: f32[8,128], index: 6, kind: input, shape index: {}]   ;;  %s1252_s7 = inlined_call_operand.hbm [shape: f32[8,128], index: 7, kind: output, shape index: {}]  }
   0x1   :  { %13 = vsyncpa [#allocation6], 0 }
   0x2   :  { %14 = vsyncpa [#allocation9], 0 }
   0x3   :  { %15 = vsyncpa [#allocation12], 0 }
   0x4   :  { %16 = vsyncpa [#allocation4], 0  ;;  %s1035_s24 = smov [#allocation5]   ;;  %s871_s28 = scalar_lea.hbm %s1246_s1, 1024 }
   0x5   :  { %s32_s25 = sshll.u32 %s1035_s24, 4  ;;  %p872_p0 = scmp.ne.s32.totalorder %s1246_s1, %s871_s28  ;;  %s33_s25 = int_to_ptr.vmem [resolvable:$true] %s32_s25 }
   0x6   :  { %p875_p1 = scmp.lt.u32.totalorder %s871_s28, %s1246_s1 }
   0x8   :  { %p877_p2 = pnand %p875_p1, %p872_p0 }
   0xa   :  { %880 = shalt.err (!%p877_p2)
}
   0xb   :  { %s881_s10 = scalar_lea.vmem %s33_s25, 1024  ;;  %p886_p4 = scmp.lt.s32.totalorder %s33_s25, %s33_s25 }
   0xc   :  { %p882_p3 = scmp.ne.s32.totalorder %s33_s25, %s881_s10  ;;  %p887_p5 = scmp.lt.s32.totalorder %s881_s10, %s881_s10 }
   0xe   :  { %p888_p6 = por %p887_p5, %p886_p4 }
  0x10   :  { %p889_p7 = pnand %p888_p6, %p882_p3 }
  0x12   :  { %892 = shalt.err (!%p889_p7)
}
  0x13   :  { %s1036_s11 = smov 64   ;;  %s1037_s12 = smov 4  }
  0x14   :  { %38 = dma.hbm_to_vmem [thread:$0]  %s1246_s1, 1024, %s33_s25, [#allocation6], %s1036_s11, %s1036_s11, %s1037_s12  }
  0x15   :  { %s1038_s15 = smov [#allocation8]   ;;  %s1039_s17 = smov [#allocation2]  }
  0x16   :  { %s54_s16 = sshll.u32 %s1038_s15, 4  ;;  %s23_s18 = sshll.u32 %s1039_s17, 4  ;;  %s55_s16 = int_to_ptr.vmem [resolvable:$true] %s54_s16  ;;  %s24_s18 = int_to_ptr.vmem [resolvable:$true] %s23_s18 }
  0x17   :  { %s893_s21 = scalar_lea.hbm %s1248_s3, 2048 }
  0x18   :  { %p894_p8 = scmp.ne.s32.totalorder %s1248_s3, %s893_s21  ;;  %p897_p9 = scmp.lt.u32.totalorder %s893_s21, %s1248_s3 }
  0x1a   :  { %p899_p10 = pnand %p897_p9, %p894_p8 }
  0x1c   :  { %902 = shalt.err (!%p899_p10)
}
  0x1d   :  { %s903_s1 = scalar_lea.vmem %s55_s16, 2048  ;;  %p908_p12 = scmp.lt.s32.totalorder %s55_s16, %s55_s16 }
  0x1e   :  { %p904_p11 = scmp.ne.s32.totalorder %s55_s16, %s903_s1  ;;  %p909_p13 = scmp.lt.s32.totalorder %s903_s1, %s903_s1 }
  0x20   :  { %p910_p0 = por %p909_p13, %p908_p12 }
  0x22   :  { %p911_p1 = pnand %p910_p0, %p904_p11 }
  0x24   :  { %914 = shalt.err (!%p911_p1)
}
  0x25   :  { %60 = dma.hbm_to_vmem [thread:$0]  %s1248_s3, 2048, %s55_s16, [#allocation9], %s1036_s11, %s1036_s11, %s1037_s12  }
  0x26   :  { %s915_s30 = scalar_lea.hbm %s1245_s0, 64 }
  0x27   :  { %p916_p2 = scmp.ne.s32.totalorder %s1245_s0, %s915_s30  ;;  %p919_p3 = scmp.lt.u32.totalorder %s915_s30, %s1245_s0 }
  0x29   :  { %p921_p4 = pnand %p919_p3, %p916_p2 }
  0x2b   :  { %924 = shalt.err (!%p921_p4)
}
  0x2c   :  { %s925_s14 = scalar_lea.vmem %s24_s18, 64  ;;  %p930_p6 = scmp.lt.s32.totalorder %s24_s18, %s24_s18 }
  0x2d   :  { %p926_p5 = scmp.ne.s32.totalorder %s24_s18, %s925_s14  ;;  %p931_p7 = scmp.lt.s32.totalorder %s925_s14, %s925_s14 }
  0x2f   :  { %p932_p8 = por %p931_p7, %p930_p6 }
  0x31   :  { %p933_p9 = pnand %p932_p8, %p926_p5 }
  0x33   :  { %936 = shalt.err (!%p933_p9)
}
  0x34   :  { %26 = dma.hbm_to_vmem [thread:$0]  %s1245_s0, 64, %s24_s18, [#allocation3]  }
  0x35   :  { %s1040_s16 = smov [#allocation7]   ;;  %s1041_s19 = smov [#allocation10]  }
  0x36   :  { %s45_s17 = sshll.u32 %s1040_s16, 4  ;;  %s66_s20 = sshll.u32 %s1041_s19, 4  ;;  %s46_s17 = int_to_ptr.vmem [resolvable:$true] %s45_s17  ;;  %s67_s20 = int_to_ptr.vmem [resolvable:$true] %s66_s20 }
  0x37   :  { %s937_s23 = scalar_lea.hbm %s1247_s2, 128 }
  0x38   :  { %p938_p10 = scmp.ne.s32.totalorder %s1247_s2, %s937_s23  ;;  %p941_p11 = scmp.lt.u32.totalorder %s937_s23, %s1247_s2 }
  0x3a   :  { %p943_p12 = pnand %p941_p11, %p938_p10 }
  0x3c   :  { %946 = shalt.err (!%p943_p12)
}
  0x3d   :  { %s947_s0 = scalar_lea.vmem %s46_s17, 128  ;;  %p952_p0 = scmp.lt.s32.totalorder %s46_s17, %s46_s17 }
  0x3e   :  { %p948_p13 = scmp.ne.s32.totalorder %s46_s17, %s947_s0  ;;  %p953_p1 = scmp.lt.s32.totalorder %s947_s0, %s947_s0 }
  0x40   :  { %p954_p2 = por %p953_p1, %p952_p0 }
  0x42   :  { %p955_p3 = pnand %p954_p2, %p948_p13 }
  0x44   :  { %958 = shalt.err (!%p955_p3)
}
  0x45   :  { %48 = dma.hbm_to_vmem [thread:$0]  %s1247_s2, 128, %s46_s17, [#allocation6]  }
  0x46   :  { %s959_s30 = scalar_lea.hbm %s1249_s4, 256 }
  0x47   :  { %p960_p4 = scmp.ne.s32.totalorder %s1249_s4, %s959_s30  ;;  %p963_p5 = scmp.lt.u32.totalorder %s959_s30, %s1249_s4 }
  0x49   :  { %p965_p6 = pnand %p963_p5, %p960_p4 }
  0x4b   :  { %968 = shalt.err (!%p965_p6)
}
  0x4c   :  { %s969_s14 = scalar_lea.vmem %s67_s20, 256  ;;  %p974_p8 = scmp.lt.s32.totalorder %s67_s20, %s67_s20 }
  0x4d   :  { %p970_p7 = scmp.ne.s32.totalorder %s67_s20, %s969_s14  ;;  %p975_p9 = scmp.lt.s32.totalorder %s969_s14, %s969_s14 }
  0x4f   :  { %p976_p10 = por %p975_p9, %p974_p8 }
  0x51   :  { %p977_p11 = pnand %p976_p10, %p970_p7 }
  0x53   :  { %980 = shalt.err (!%p977_p11)
}
  0x54   :  { %s1042_s2 = smov 128   ;;  %s1043_s3 = smov 8  }
  0x55   :  { %72 = dma.hbm_to_vmem [thread:$0]  %s1249_s4, 256, %s67_s20, [#allocation9], %s1042_s2, %s1042_s2, %s1043_s3  }
  0x56   :  { %s1044_s17 = smov [#allocation11]   ;;  %s981_s23 = scalar_lea.hbm %s1250_s5, 1024 }
  0x57   :  { %s78_s19 = sshll.u32 %s1044_s17, 4  ;;  %p982_p12 = scmp.ne.s32.totalorder %s1250_s5, %s981_s23  ;;  %s79_s19 = int_to_ptr.vmem [resolvable:$true] %s78_s19 }
  0x58   :  { %p985_p13 = scmp.lt.u32.totalorder %s981_s23, %s1250_s5 }
  0x5a   :  { %p987_p0 = pnand %p985_p13, %p982_p12 }
  0x5c   :  { %990 = shalt.err (!%p987_p0)
}
  0x5d   :  { %s991_s0 = scalar_lea.vmem %s79_s19, 1024  ;;  %p996_p2 = scmp.lt.s32.totalorder %s79_s19, %s79_s19 }
  0x5e   :  { %p992_p1 = scmp.ne.s32.totalorder %s79_s19, %s991_s0  ;;  %p997_p3 = scmp.lt.s32.totalorder %s991_s0, %s991_s0 }
  0x60   :  { %p998_p4 = por %p997_p3, %p996_p2 }
  0x62   :  { %p999_p5 = pnand %p998_p4, %p992_p1 }
  0x64   :  { %1002 = shalt.err (!%p999_p5)
}
  0x65   :  { %84 = dma.hbm_to_vmem [thread:$0]  %s1250_s5, 1024, %s79_s19, [#allocation12], %s1036_s11, %s1036_s11, %s1037_s12  }
  0x66   :  { %1025 = dma.done.wait [#allocation3], 64  }
  0x67   :  { %1026 = vsyncadd [#allocation3], 4294967232 }
  0x68   :  { %1027 = dma.done.wait [#allocation6], 1152  }
  0x69   :  { %1028 = vsyncadd [#allocation6], 4294966144 }
  0x6a   :  { %1029 = dma.done.wait [#allocation9], 2304  }
  0x6b   :  { %1030 = vsyncadd [#allocation9], 4294964992 }
  0x6c   :  { %1031 = dma.done.wait [#allocation12], 1024  }
  0x6d   :  { %1032 = vsyncadd [#allocation12], 4294966272  ;;  %v1045_v0 = vmov 0.0   ;;  %vm1046_vm0 = vmmov 0   ;;  %v823_v1 = vld [vmem:[#allocation5] sm:$0xff]   ;;  %v824_v2 = vld [vmem:[#allocation5 + $0x8] sm:$0xff]   ;;  %v106_v10 = vlaneseq }
  0x6e   :  { %730 = vmatprep.subr.bf16.mxu0 %v1045_v0  ;;  %746 = vmatprep.mubr.msk.bf16.mxu0 %vm1046_vm0, %v1045_v0  ;;  %v825_v3 = vld [vmem:[#allocation5 + $0x10] sm:$0xff]   ;;  %v826_v4 = vld [vmem:[#allocation5 + $0x18] sm:$0xff]   ;;  %v827_v5 = vld [vmem:[#allocation5 + $0x20] sm:$0xff]   ;;  %s1047_s12 = smov [#allocation13]  }
  0x6f   :  { %750 = vmatprep.subr.bf16.mxu1 %v1045_v0  ;;  %766 = vmatprep.mubr.msk.bf16.mxu1 %vm1046_vm0, %v1045_v0  ;;  %v828_v6 = vld [vmem:[#allocation5 + $0x28] sm:$0xff]   ;;  %v829_v7 = vld [vmem:[#allocation5 + $0x30] sm:$0xff]   ;;  %v830_v8 = vld [vmem:[#allocation5 + $0x38] sm:$0xff]   ;;  %v130_v11 = vshrl.u32 %v106_v10, 7  ;;  %v107_v20 = vand.u32 127, %v106_v10  ;;  %s647_s18 = sshll.u32 %s1047_s12, 4  ;;  %s648_s18 = int_to_ptr.vmem [resolvable:$true] %s647_s18 }
  0x70   :  { %731 = vmatpush3.bf16.msra.mxu0 %v823_v1  ;;  %v111_v9 = vld [vmem:[#allocation2] sm:$0xf]  ;;  %v128_v13 = vld [vmem:[#allocation7] sm:$0xff]  ;;  %v831_v27 = vld [vmem:[#allocation8] sm:$0xff]   ;;  %s1003_s27 = scalar_lea.vmem %s648_s18, 128  ;;  %p1008_p7 = scmp.lt.s32.totalorder %s648_s18, %s648_s18 }
  0x71   :  { %732 = vmatprep.subr.bf16.mxu0 %v1045_v0  ;;  %v1185_v12 = vsub.s32 0, %v130_v11  ;;  %vm108_vm1 = vcmp.lt.s32.totalorder %v107_v20, 32  ;;  %751 = vmatpush3.bf16.msra.mxu1 %v831_v27  ;;  %v832_v28 = vld [vmem:[#allocation8 + $0x8] sm:$0xff]   ;;  %v833_v29 = vld [vmem:[#allocation8 + $0x10] sm:$0xff]   ;;  %v834_v30 = vld [vmem:[#allocation8 + $0x18] sm:$0xff]   ;;  %v1200_v38 = vsub.s32 1, %v130_v11  ;;  %p1004_p6 = scmp.ne.s32.totalorder %s648_s18, %s1003_s27  ;;  %p1009_p8 = scmp.lt.s32.totalorder %s1003_s27, %s1003_s27 }
  0x72   :  { %v1189_v23 = vsel %vm108_vm1, 1.0, %v1045_v0  ;;  %752 = vmatprep.subr.bf16.mxu1 %v1045_v0  ;;  %v835_v31 = vld [vmem:[#allocation8 + $0x20] sm:$0xff]   ;;  %v836_v32 = vld [vmem:[#allocation8 + $0x28] sm:$0xff]   ;;  %v837_v33 = vld [vmem:[#allocation8 + $0x30] sm:$0xff]   ;;  %v1202_v39 = vsub.s32 2, %v130_v11 }
  0x73   :  { %v132_v14 = vrot.slane %v128_v13, %v1185_v12  ;;  %v838_v34 = vld [vmem:[#allocation8 + $0x38] sm:$0xff]   ;;  %v236_v40 = vrot.slane %v128_v13, %v1200_v38  ;;  %v265_v52 = vld [vmem:[#allocation10] sm:$0xff]  ;;  %p1010_p9 = por %p1009_p8, %p1008_p7 }
  0x74   :  { %733 = vmatpush3.bf16.msra.mxu0 %v824_v2  ;;  %v241_v42 = vrot.slane %v128_v13, %v1202_v39  ;;  %v269_v53 = vrot.slane %v265_v52, %v1185_v12  ;;  %v839_v1 = vld [vmem:[#allocation8 + $0x40] sm:$0xff]   ;;  %v840_v2 = vld [vmem:[#allocation8 + $0x48] sm:$0xff]   ;;  %v373_v13 = vrot.slane %v265_v52, %v1200_v38 }
  0x75   :  { %734 = vmatprep.subr.bf16.mxu0 %v1045_v0  ;;  %753 = vmatpush3.bf16.msra.mxu1 %v832_v28  ;;  %p1011_p10 = pnand %p1010_p9, %p1004_p6 }
  0x76   :  { %754 = vmatprep.subr.bf16.mxu1 %v1045_v0 }
  0x78   :  { %735 = vmatpush3.bf16.msra.mxu0 %v825_v3  ;;  %v841_v3 = vld [vmem:[#allocation8 + $0x50] sm:$0xff]  }
  0x79   :  { %736 = vmatprep.subr.bf16.mxu0 %v1045_v0  ;;  %755 = vmatpush3.bf16.msra.mxu1 %v833_v29 }
  0x7a   :  { %756 = vmatprep.subr.bf16.mxu1 %v1045_v0 }
  0x7c   :  { %737 = vmatpush3.bf16.msra.mxu0 %v826_v4  ;;  %v842_v4 = vld [vmem:[#allocation8 + $0x58] sm:$0xff]  }
  0x7d   :  { %738 = vmatprep.subr.bf16.mxu0 %v1045_v0  ;;  %757 = vmatpush3.bf16.msra.mxu1 %v834_v30 }
  0x7e   :  { %758 = vmatprep.subr.bf16.mxu1 %v1045_v0 }
  0x80   :  { %739 = vmatpush3.bf16.msra.mxu0 %v827_v5  ;;  %v843_v5 = vld [vmem:[#allocation8 + $0x60] sm:$0xff]  }
  0x81   :  { %740 = vmatprep.subr.bf16.mxu0 %v1045_v0  ;;  %759 = vmatpush3.bf16.msra.mxu1 %v835_v31 }
  0x82   :  { %760 = vmatprep.subr.bf16.mxu1 %v1045_v0 }
  0x84   :  { %741 = vmatpush3.bf16.msra.mxu0 %v828_v6  ;;  %v844_v6 = vld [vmem:[#allocation8 + $0x68] sm:$0xff]  }
  0x85   :  { %742 = vmatprep.subr.bf16.mxu0 %v1045_v0  ;;  %761 = vmatpush3.bf16.msra.mxu1 %v836_v32 }
  0x86   :  { %762 = vmatprep.subr.bf16.mxu1 %v1045_v0 }
  0x88   :  { %743 = vmatpush3.bf16.msra.mxu0 %v829_v7  ;;  %v845_v7 = vld [vmem:[#allocation8 + $0x70] sm:$0xff]  }
  0x89   :  { %744 = vmatprep.subr.bf16.mxu0 %v1045_v0  ;;  %763 = vmatpush3.bf16.msra.mxu1 %v837_v33 }
  0x8a   :  { %764 = vmatprep.subr.bf16.mxu1 %v1045_v0 }
  0x8c   :  { %745 = vmatpush3.bf16.msra.mxu0 %v830_v8  ;;  %v846_v8 = vld [vmem:[#allocation8 + $0x78] sm:$0xff]  }
  0x8d   :  { %770 = vmatprep.subr.bf16.mxu0 %v1045_v0  ;;  %765 = vmatpush3.bf16.msra.mxu1 %v838_v34 }
  0x8e   :  { %790 = vmatprep.subr.bf16.mxu1 %v1045_v0 }
  0x8f   :  { %747 = vmatmul.mubr.bf16.vlgmr.msra.gmra.mrb[0].mxu0 %v111_v9 }
  0x90   :  { %786 = vmatprep.mubr.msk.bf16.mxu0 %vm1046_vm0, %v1045_v0  ;;  %771 = vmatpush3.bf16.msra.mxu0 %v839_v1 }
  0x91   :  { %772 = vmatprep.subr.bf16.mxu0 %v1045_v0 }
  0x94   :  { %773 = vmatpush3.bf16.msra.mxu0 %v840_v2 }
  0x95   :  { %774 = vmatprep.subr.bf16.mxu0 %v1045_v0 }
  0x98   :  { %775 = vmatpush3.bf16.msra.mxu0 %v841_v3 }
  0x99   :  { %776 = vmatprep.subr.bf16.mxu0 %v1045_v0 }
  0x9c   :  { %777 = vmatpush3.bf16.msra.mxu0 %v842_v4 }
  0x9d   :  { %778 = vmatprep.subr.bf16.mxu0 %v1045_v0 }
  0xa0   :  { %779 = vmatpush3.bf16.msra.mxu0 %v843_v5 }
  0xa1   :  { %780 = vmatprep.subr.bf16.mxu0 %v1045_v0 }
  0xa4   :  { %781 = vmatpush3.bf16.msra.mxu0 %v844_v6 }
  0xa5   :  { %782 = vmatprep.subr.bf16.mxu0 %v1045_v0 }
  0xa8   :  { %783 = vmatpush3.bf16.msra.mxu0 %v845_v7 }
  0xa9   :  { %784 = vmatprep.subr.bf16.mxu0 %v1045_v0 }
  0xac   :  { %785 = vmatpush3.bf16.msra.mxu0 %v846_v8 }
 0x162   :  { %v215_v15 = vpop.f32.mrb[0].mxu0 }
 0x163   :  { %v216_v16 = vadd.f32 %v215_v15, %v132_v14  ;;  %v748_v17 = vpop.f32.mrb[1].mxu0  ;;  %v378_v15 = vrot.slane %v265_v52, %v1202_v39 }
 0x164   :  { %v218_v18 = vpop.f32.mrb[2].mxu0 }
 0x165   :  { %221 = vadd.xlane.f32.xlu0 %v216_v16  ;;  %v749_v19 = vpop.f32.mrb[3].mxu0 }
 0x1f2   :  { %v222_v21 = vpop.xlane.xlu0 %221 }
 0x1f3   :  { %v223_v22 = vmul.f32 0.03125, %v222_v21 }
 0x1f5   :  { %v224_v24 = vsub.f32 %v216_v16, %v223_v22 }
 0x1f7   :  { %v225_v25 = vmul.f32 %v1189_v23, %v224_v24 }
 0x1f9   :  { %v226_v26 = vmul.f32 %v225_v25, %v225_v25 }
 0x1fb   :  { %227 = vadd.xlane.f32.xlu0 %v226_v26  ;;  %v404_v26 = vld [vmem:[#allocation10 + $0x8] sm:$0xff] }
 0x1fc   :  { %v408_v27 = vrot.slane %v404_v26, %v1185_v12  ;;  %v849_v12 = vld [vmem:[#allocation11 + $0x10] sm:$0xff]  }
 0x288   :  { %v228_v35 = vpop.xlane.xlu0 %227 }
 0x289   :  { %v229_v36 = vmul.f32 0.03125, %v228_v35 }
 0x28b   :  { %v230_v37 = vadd.f32 1e-05, %v229_v36 }
 0x28d   :  { %855 = vrsqrt.f32 %v230_v37 }
 0x297   :  { %v856_v41 = vpop.eup %855 }
 0x298   :  { %v232_v43 = vmul.f32 %v856_v41, %v224_v24  ;;  %v848_v41 = vld [vmem:[#allocation11 + $0x8] sm:$0xff]  }
 0x29a   :  { %v237_v44 = vmul.f32 %v236_v40, %v232_v43  ;;  %v847_v40 = vld [vmem:[#allocation11] sm:$0xff]  }
 0x29b   :  { %v851_v43 = vld [vmem:[#allocation11 + $0x20] sm:$0xff]  }
 0x29c   :  { %v242_v45 = vadd.f32 %v241_v42, %v237_v44  ;;  %v850_v42 = vld [vmem:[#allocation11 + $0x18] sm:$0xff]   ;;  %v853_v44 = vld [vmem:[#allocation11 + $0x30] sm:$0xff]  }
 0x29e   :  { %v244_v46 = vmul.f32 0.70710677, %v242_v45  ;;  %v243_v48 = vmul.f32 0.5, %v242_v45  ;;  %v854_v45 = vld [vmem:[#allocation11 + $0x38] sm:$0xff]  }
 0x2a0   :  { %857 = verf.f32 %v244_v46 }
 0x2aa   :  { %v858_v47 = vpop.eup %857 }
 0x2ab   :  { %v246_v49 = vadd.f32 1.0, %v858_v47 }
 0x2ad   :  { %v247_v50 = vmul.f32 %v246_v49, %v243_v48  ;;  %v512_v49 = vrot.slane %v404_v26, %v1200_v38 }
 0x2af   :  { %v264_v51 = vpack.c.bf16 %v247_v50, %v247_v50 }
 0x2b1   :  { %767 = vmatmul.mubr.bf16.vlgmr.msra.gmra.mrb[0].mxu1 %v264_v51  ;;  %v517_v51 = vrot.slane %v404_v26, %v1202_v39 }
 0x2b2   :  { %806 = vmatprep.mubr.msk.bf16.mxu1 %vm1046_vm0, %v1045_v0  ;;  %791 = vmatpush3.bf16.msra.mxu1 %v847_v40 }
 0x2b3   :  { %792 = vmatprep.subr.bf16.mxu1 %v1045_v0 }
 0x2b6   :  { %793 = vmatpush3.bf16.msra.mxu1 %v848_v41 }
 0x2b7   :  { %794 = vmatprep.subr.bf16.mxu1 %v1045_v0 }
 0x2ba   :  { %795 = vmatpush3.bf16.msra.mxu1 %v849_v12 }
 0x2bb   :  { %796 = vmatprep.subr.bf16.mxu1 %v1045_v0 }
 0x2be   :  { %797 = vmatpush3.bf16.msra.mxu1 %v850_v42 }
 0x2bf   :  { %798 = vmatprep.subr.bf16.mxu1 %v1045_v0 }
 0x2c2   :  { %799 = vmatpush3.bf16.msra.mxu1 %v851_v43 }
 0x2c3   :  { %800 = vmatprep.subr.bf16.mxu1 %v1045_v0 }
 0x384   :  { %v352_v54 = vpop.f32.mrb[0].mxu1 }
 0x385   :  { %v353_v55 = vadd.f32 %v352_v54, %v269_v53  ;;  %v768_v56 = vpop.f32.mrb[1].mxu1 }
 0x386   :  { %v355_v57 = vpop.f32.mrb[2].mxu1 }
 0x387   :  { %358 = vadd.xlane.f32.xlu1 %v353_v55  ;;  %v769_v58 = vpop.f32.mrb[3].mxu1 }
 0x414   :  { %v359_v59 = vpop.xlane.xlu1 %358 }
 0x415   :  { %v360_v60 = vmul.f32 0.03125, %v359_v59 }
 0x417   :  { %v361_v61 = vsub.f32 %v353_v55, %v360_v60  ;;  %v684_v60 = vld [vmem:[%s1251_s6] ss:$0 sm:$0xff] }
 0x419   :  { %v362_v62 = vmul.f32 %v1189_v23, %v361_v61 }
 0x41b   :  { %v363_v63 = vmul.f32 %v362_v62, %v362_v62 }
 0x41d   :  { %364 = vadd.xlane.f32.xlu1 %v363_v63 }
 0x4aa   :  { %v365_v9 = vpop.xlane.xlu1 %364 }
 0x4ab   :  { %v366_v10 = vmul.f32 0.03125, %v365_v9 }
 0x4ad   :  { %v367_v11 = vadd.f32 1e-05, %v366_v10 }
 0x4af   :  { %859 = vrsqrt.f32 %v367_v11 }
 0x4b9   :  { %v860_v14 = vpop.eup %859 }
 0x4ba   :  { %v369_v16 = vmul.f32 %v860_v14, %v361_v61 }
 0x4bc   :  { %v374_v17 = vmul.f32 %v373_v13, %v369_v16 }
 0x4be   :  { %v379_v18 = vadd.f32 %v378_v15, %v374_v17 }
 0x4c0   :  { %v381_v19 = vmul.f32 0.70710677, %v379_v18  ;;  %v380_v21 = vmul.f32 0.5, %v379_v18 }
 0x4c2   :  { %861 = verf.f32 %v381_v19 }
 0x4cc   :  { %v862_v20 = vpop.eup %861 }
 0x4cd   :  { %v383_v22 = vadd.f32 1.0, %v862_v20 }
 0x4cf   :  { %v384_v24 = vmul.f32 %v383_v22, %v380_v21 }
 0x4d1   :  { %v402_v25 = vpack.c.bf16 %v384_v24, %v384_v24 }
 0x4d3   :  { %787 = vmatmul.mubr.bf16.vlgmr.msra.gmra.mrb[4].mxu0 %v402_v25 }
 0x5a6   :  { %v491_v28 = vpop.f32.mrb[4].mxu0 }
 0x5a7   :  { %v492_v29 = vadd.f32 %v491_v28, %v408_v27  ;;  %v788_v30 = vpop.f32.mrb[5].mxu0 }
 0x5a8   :  { %v494_v31 = vpop.f32.mrb[6].mxu0 }
 0x5a9   :  { %497 = vadd.xlane.f32.xlu0 %v492_v29  ;;  %v789_v32 = vpop.f32.mrb[7].mxu0 }
 0x636   :  { %v498_v33 = vpop.xlane.xlu0 %497 }
 0x637   :  { %v499_v34 = vmul.f32 0.03125, %v498_v33 }
 0x639   :  { %v500_v35 = vsub.f32 %v492_v29, %v499_v34 }
 0x63b   :  { %v501_v36 = vmul.f32 %v1189_v23, %v500_v35  ;;  %v852_v23 = vld [vmem:[#allocation11 + $0x28] sm:$0xff]  }
 0x63c   :  { %801 = vmatpush3.bf16.msra.mxu1 %v852_v23 }
 0x63d   :  { %v502_v37 = vmul.f32 %v501_v36, %v501_v36  ;;  %802 = vmatprep.subr.bf16.mxu1 %v1045_v0 }
 0x63f   :  { %503 = vadd.xlane.f32.xlu1 %v502_v37 }
 0x640   :  { %803 = vmatpush3.bf16.msra.mxu1 %v853_v44 }
 0x641   :  { %804 = vmatprep.subr.bf16.mxu1 %v1045_v0 }
 0x644   :  { %805 = vmatpush3.bf16.msra.mxu1 %v854_v45 }
 0x6cc   :  { %v504_v46 = vpop.xlane.xlu1 %503 }
 0x6cd   :  { %v505_v47 = vmul.f32 0.03125, %v504_v46 }
 0x6cf   :  { %v506_v48 = vadd.f32 1e-05, %v505_v47 }
 0x6d1   :  { %863 = vrsqrt.f32 %v506_v48 }
 0x6db   :  { %v864_v50 = vpop.eup %863 }
 0x6dc   :  { %v508_v52 = vmul.f32 %v864_v50, %v500_v35 }
 0x6de   :  { %v513_v53 = vmul.f32 %v512_v49, %v508_v52 }
 0x6e0   :  { %v518_v54 = vadd.f32 %v517_v51, %v513_v53 }
 0x6e2   :  { %v520_v55 = vmul.f32 0.70710677, %v518_v54  ;;  %v519_v57 = vmul.f32 0.5, %v518_v54 }
 0x6e4   :  { %865 = verf.f32 %v520_v55 }
 0x6ee   :  { %v866_v56 = vpop.eup %865 }
 0x6ef   :  { %v522_v58 = vadd.f32 1.0, %v866_v56 }
 0x6f1   :  { %v523_v59 = vmul.f32 %v522_v58, %v519_v57 }
 0x6f3   :  { %v540_v0 = vpack.c.bf16 %v523_v59, %v523_v59 }
 0x6f5   :  { %807 = vmatmul.mubr.bf16.vlgmr.msra.gmra.mrb[4].mxu1 %v540_v0 }
 0x7c8   :  { %v628_v61 = vpop.f32.mrb[4].mxu1 }
 0x7c9   :  { %v629_v38 = vadd.f32 %v684_v60, %v628_v61  ;;  %v808_v62 = vpop.f32.mrb[5].mxu1 }
 0x7ca   :  { %v631_v63 = vpop.f32.mrb[6].mxu1 }
 0x7cb   :  { %v693_v39 = vmul.f32 -1.442695, %v629_v38  ;;  %v809_v1 = vpop.f32.mrb[7].mxu1 }
 0x7cd   :  { %867 = vpow2.f32 %v693_v39 }
 0x7d7   :  { %v868_v2 = vpop.eup %867 }
 0x7d8   :  { %v637_v3 = vadd.f32 1.0, %v868_v2 }
 0x7da   :  { %869 = vrcp.f32 %v637_v3 }
 0x7e4   :  { %v870_v4 = vpop.eup %869 }
 0x7e5   :  { %640 = vst [vmem:[#allocation13] sm:$0xff] %v870_v4 }
 0x7e6   :  { %1014 = shalt.err (!%p1011_p10)
}
 0x7e7   :  { %s1015_s29 = scalar_lea.hbm %s1252_s7, 128 }
 0x7e8   :  { %p1016_p11 = scmp.ne.s32.totalorder %s1252_s7, %s1015_s29  ;;  %p1019_p12 = scmp.lt.u32.totalorder %s1015_s29, %s1252_s7 }
 0x7ea   :  { %p1021_p13 = pnand %p1019_p12, %p1016_p11 }
 0x7ec   :  { %1024 = shalt.err (!%p1021_p13)
}
 0x7ed   :  { %650 = dma.vmem_to_hbm [thread:$0]  %s648_s18, 128, %s1252_s7, [#allocation4]  }
 0x7ee   :  { %1033 = dma.done.wait [#allocation4], 128  }
 0x7ef   :  { %1034 = vsyncadd [#allocation4], 4294967168 }
 0x7f0   :  { %654 = vsyncpa [#allocation3], 1 }
 0x7f1   :  { %655 = vsyncpa [#allocation6], 1 }
 0x7f2   :  { %656 = vsyncpa [#allocation9], 1 }
 0x7f3   :  { %657 = vsyncpa [#allocation12], 1 }
 0x7f4   :  { %658 = vsyncpa [#allocation4], 1 }

</bundles_post_ra>
